<compile_context>
chip_gen: v7x
topology: tpu7x:2x2x1
jax: 0.10.0
libtpu: 0.0.40
codegen_flags: <defaults>
</compile_context>

<pallas_src>
import jax
import jax.numpy as jnp
from jax.experimental import pallas as pl
from jax.experimental.pallas import tpu as pltpu

FC1_UNITS = 256
FC2_UNITS = 128


def _round_up(x, m):
    return ((x + m - 1) // m) * m


def _choose_tiles(B, tile_b):
    """Pick (TB, num_tiles, B_pad) minimizing grid steps and batch padding."""
    num_tiles = max(1, -(-B // tile_b))
    # Guarantee >=2 tiles for mid/large batches so the "parallel" axis can
    # shard across both TensorCores on v7x (near no-op on v5e/v6e).
    if num_tiles == 1 and B >= 256:
        num_tiles = 2
    tb_raw = -(-B // num_tiles)
    # Lane-dense (multiple-of-128) tiles for big batches; multiple of 16
    # (bf16 sublane packing) for tiny ones.
    align = 128 if tb_raw >= 128 else 16
    TB = _round_up(tb_raw, align)
    return TB, num_tiles, TB * num_tiles


def _critic_kernel(s_ref, a_ref, w1_ref, b1_ref, w2s_ref, w2a_ref, b2_ref,
                   w3_ref, b3_ref, out_ref):
    # Activations arrive f32; cast to bf16 on the VPU (free slot). Weights
    # arrive pre-cast to bf16 from prepare_critic_params.
    s = s_ref[...].astype(jnp.bfloat16)                      # (TB, S)
    a = a_ref[...].astype(jnp.bfloat16)                      # (TB, A)

    # fc1 + bias + relu.  The (TB, fc1) intermediate is materialized in bf16
    # only (store/reload traffic is the binding slot here, not the MXU).
    xs = jnp.dot(s, w1_ref[...], preferred_element_type=jnp.float32)
    xs = jnp.maximum(xs + b1_ref[...], 0.0).astype(jnp.bfloat16)

    # fc2 on concat(xs, action) == xs @ W2[:fc1] + action @ W2[fc1:].
    h = jnp.dot(xs, w2s_ref[...], preferred_element_type=jnp.float32)
    h = h + jnp.dot(a, w2a_ref[...], preferred_element_type=jnp.float32)
    h = jnp.maximum(h + b2_ref[...], 0.0)                    # (TB, fc2) f32

    # fc3 (out_features == 1): contract over fc2 with the batch mapped to the
    # LANE axis so the per-tile output is a lane-dense (1, TB) row (no masked
    # (TB, 1) column stores).  w3 is pre-padded to (8, fc2): row 0 holds the
    # real weights, rows 1..7 are zero, so both MXU operands are tile-aligned.
    q = jax.lax.dot_general(w3_ref[...], h,
                            dimension_numbers=(((1,), (1,)), ((), ())),
                            preferred_element_type=jnp.float32)   # (8, TB)
    out_ref[0] = (q[0:1, :] + b3_ref[...]).astype(out_ref.dtype)  # (1, TB)


def prepare_critic_params(params):
    """One-time parameter preprocessing (hoisted out of the forward path).

    Splits W2 into its state/action halves, casts matmul weights to bf16,
    reshapes biases, and zero-pads W3 to 8 sublanes.  Call once and reuse.
    """
    w1, b1, w2, b2, w3, b3 = (params[k] for k in
                              ("w1", "b1", "w2", "b2", "w3", "b3"))
    fc1 = w1.shape[1]
    fc2 = w2.shape[1]
    w3_row = jnp.asarray(w3, jnp.float32).reshape(1, fc2)
    w3_pad = jnp.concatenate([w3_row, jnp.zeros((7, fc2), jnp.float32)], axis=0)
    return {
        "w1": jnp.asarray(w1, jnp.bfloat16),                    # (S, fc1)
        "b1": jnp.asarray(b1, jnp.float32).reshape(1, fc1),
        "w2s": jnp.asarray(w2[:fc1, :], jnp.bfloat16),          # (fc1, fc2)
        "w2a": jnp.asarray(w2[fc1:, :], jnp.bfloat16),          # (A, fc2)
        "b2": jnp.asarray(b2, jnp.float32).reshape(1, fc2),
        "w3": w3_pad,                                           # (8, fc2)
        "b3": jnp.asarray(b3, jnp.float32).reshape(1, 1),
    }


def critic_forward(state, action, prep, tile_b=4096):
    """state: (B, S) f32, action: (B, A) f32, prep: prepare_critic_params(...).

    Returns (B, 1) float32 Q-values.
    """
    B, S = state.shape
    A = action.shape[1]
    fc1 = prep["w1"].shape[1]
    fc2 = prep["w2s"].shape[1]

    TB, num_tiles, B_pad = _choose_tiles(B, tile_b)
    state = state.astype(jnp.float32)
    action = action.astype(jnp.float32)
    if B_pad != B:
        state = jnp.pad(state, ((0, B_pad - B), (0, 0)))
        action = jnp.pad(action, ((0, B_pad - B), (0, 0)))

    flops = 2 * B_pad * (S * fc1 + fc1 * fc2 + A * fc2 + fc2)
    bytes_accessed = int(
        B_pad * (S + A) * 4 + B_pad * 4
        + 2 * (prep["w1"].size + prep["w2s"].size + prep["w2a"].size)
        + 4 * (prep["b1"].size + prep["b2"].size + prep["w3"].size + 1))

    out = pl.pallas_call(
        _critic_kernel,
        out_shape=jax.ShapeDtypeStruct((num_tiles, 1, TB), jnp.float32),
        grid=(num_tiles,),
        in_specs=[
            pl.BlockSpec((TB, S), lambda i: (i, 0)),       # state tile (pipelined)
            pl.BlockSpec((TB, A), lambda i: (i, 0)),       # action tile (pipelined)
            pl.BlockSpec((S, fc1), lambda i: (0, 0)),      # w1        (resident)
            pl.BlockSpec((1, fc1), lambda i: (0, 0)),      # b1
            pl.BlockSpec((fc1, fc2), lambda i: (0, 0)),    # w2 state half
            pl.BlockSpec((A, fc2), lambda i: (0, 0)),      # w2 action half
            pl.BlockSpec((1, fc2), lambda i: (0, 0)),      # b2
            pl.BlockSpec((8, fc2), lambda i: (0, 0)),      # w3 (row 0 real)
            pl.BlockSpec((1, 1), lambda i: (0, 0)),        # b3
        ],
        out_specs=pl.BlockSpec((1, 1, TB), lambda i: (i, 0, 0)),
        compiler_params=pltpu.CompilerParams(
            dimension_semantics=("parallel",),
            vmem_limit_bytes=32 * 1024 * 1024),
        cost_estimate=pl.CostEstimate(
            flops=flops, transcendentals=0, bytes_accessed=bytes_accessed),
    )(state, action, prep["w1"], prep["b1"], prep["w2s"], prep["w2a"],
      prep["b2"], prep["w3"], prep["b3"])

    # (num_tiles, 1, TB) row-major -> flat batch order; drop padded rows.
    return out.reshape(-1)[:B].reshape(B, 1)


def init_critic_params(key, state_size, action_size,
                       fc1_units=FC1_UNITS, fc2_units=FC2_UNITS):
    """Init in the spirit of Critic.reset_parameters.

    Note: the spec's hidden_init uses layer.weight.size()[0] == out_features,
    so lim = 1/sqrt(fc1_units) / 1/sqrt(fc2_units) matches the original.
    Weights are stored transposed relative to PyTorch: (in_features, out_features).
    (Exact PyTorch *bias* init parity is not reproduced; forward semantics are.)
    """
    k1, k2, k3, k4, k5, k6 = jax.random.split(key, 6)

    lim1 = 1.0 / jnp.sqrt(jnp.float32(fc1_units))
    lim2 = 1.0 / jnp.sqrt(jnp.float32(fc2_units))
    lim3 = 0.003

    w1 = jax.random.uniform(k1, (state_size, fc1_units), jnp.float32, -lim1, lim1)
    b1 = jax.random.uniform(k4, (1, fc1_units), jnp.float32, -lim1, lim1)

    w2 = jax.random.uniform(k2, (fc1_units + action_size, fc2_units),
                            jnp.float32, -lim2, lim2)
    b2 = jax.random.uniform(k5, (1, fc2_units), jnp.float32, -lim2, lim2)

    w3 = jax.random.uniform(k3, (fc2_units, 1), jnp.float32, -lim3, lim3)
    b3 = jax.random.uniform(k6, (1, 1), jnp.float32, -lim3, lim3)

    return {"w1": w1, "b1": b1, "w2": w2, "b2": b2, "w3": w3, "b3": b3}


def critic_forward_ref(state, action, params):
    """Pure-JAX f32 reference for correctness checking."""
    xs = jax.nn.relu(state @ params["w1"] + params["b1"])
    x = jnp.concatenate([xs, action], axis=1)
    h = jax.nn.relu(x @ params["w2"] + params["b2"])
    return h @ params["w3"] + params["b3"]


if __name__ == "__main__":
    key = jax.random.PRNGKey(0)
    k_s, k_a, k_p = jax.random.split(key, 3)

    batch = 2
    state_size = 8
    action_size = 4

    state = jax.random.normal(k_s, (batch, state_size), jnp.float32)
    action = jax.random.normal(k_a, (batch, action_size), jnp.float32)
    params = init_critic_params(k_p, state_size, action_size)

    # One-time parameter prep (cache this; it is NOT part of the forward path).
    prep = prepare_critic_params(params)

    q = critic_forward(state, action, prep)
    q = jax.block_until_ready(q)

    q_ref = critic_forward_ref(state, action, params)
    assert q.shape == (batch, 1)
    # bf16 MXU operands with f32 accumulation -> loosened tolerance vs f32 ref.
    assert jnp.allclose(q, q_ref, atol=1e-2, rtol=1e-2)

    print("KERNEL_OK")
</pallas_src>

<mosaic_0001>
module attributes {stable_mosaic.version = 11 : i64} {
  func.func @_critic_kernel(%arg0: i32, %arg1: memref<16x8xf32, #tpu.memory_space<vmem>>, %arg2: memref<16x4xf32, #tpu.memory_space<vmem>>, %arg3: memref<8x256xbf16, #tpu.memory_space<vmem>>, %arg4: memref<1x256xf32, #tpu.memory_space<vmem>>, %arg5: memref<256x128xbf16, #tpu.memory_space<vmem>>, %arg6: memref<4x128xbf16, #tpu.memory_space<vmem>>, %arg7: memref<1x128xf32, #tpu.memory_space<vmem>>, %arg8: memref<8x128xf32, #tpu.memory_space<vmem>>, %arg9: memref<1x1xf32, #tpu.memory_space<vmem>>, %arg10: memref<1x1x16xf32, #tpu.memory_space<vmem>>) attributes {dimension_semantics = [#tpu.dimension_semantics<parallel>], iteration_bounds = array<i64: 1>, scalar_prefetch = 0 : i64, scratch_operands = 0 : i64, tpu.core_type = #tpu.core_type<tc>, window_params = [{transform_indices = @transform_0, window_bounds = array<i64: 16, 8>}, {transform_indices = @transform_1, window_bounds = array<i64: 16, 4>}, {pipeline_mode = #tpu.pipeline_mode<synchronous>, transform_indices = @transform_2, window_bounds = array<i64: 8, 256>}, {pipeline_mode = #tpu.pipeline_mode<synchronous>, transform_indices = @transform_3, window_bounds = array<i64: 1, 256>}, {pipeline_mode = #tpu.pipeline_mode<synchronous>, transform_indices = @transform_4, window_bounds = array<i64: 256, 128>}, {pipeline_mode = #tpu.pipeline_mode<synchronous>, transform_indices = @transform_5, window_bounds = array<i64: 4, 128>}, {pipeline_mode = #tpu.pipeline_mode<synchronous>, transform_indices = @transform_6, window_bounds = array<i64: 1, 128>}, {pipeline_mode = #tpu.pipeline_mode<synchronous>, transform_indices = @transform_7, window_bounds = array<i64: 8, 128>}, {pipeline_mode = #tpu.pipeline_mode<synchronous>, transform_indices = @transform_8, window_bounds = array<i64: 1, 1>}, {transform_indices = @transform_9, window_bounds = array<i64: 1, 1, 16>}]} {
    %c0 = arith.constant 0 : index
    %c0_0 = arith.constant 0 : index
    %0 = vector.load %arg1[%c0, %c0_0] : memref<16x8xf32, #tpu.memory_space<vmem>>, vector<16x8xf32>
    %1 = arith.truncf %0 : vector<16x8xf32> to vector<16x8xbf16>
    %c0_1 = arith.constant 0 : index
    %c0_2 = arith.constant 0 : index
    %2 = vector.load %arg2[%c0_1, %c0_2] : memref<16x4xf32, #tpu.memory_space<vmem>>, vector<16x4xf32>
    %3 = arith.truncf %2 : vector<16x4xf32> to vector<16x4xbf16>
    %c0_3 = arith.constant 0 : index
    %c0_4 = arith.constant 0 : index
    %4 = vector.load %arg3[%c0_3, %c0_4] : memref<8x256xbf16, #tpu.memory_space<vmem>>, vector<8x256xbf16>
    %cst = arith.constant dense<0.000000e+00> : vector<16x256xf32>
    %5 = tpu.matmul %1, %4, %cst {dimension_numbers = #tpu.dot_dimension_numbers<[1], [0], [0], [1], [0, 0, 1, 1], [], []>} : vector<16x8xbf16>, vector<8x256xbf16>, vector<16x256xf32> -> vector<16x256xf32>
    %c0_5 = arith.constant 0 : index
    %c0_6 = arith.constant 0 : index
    %6 = vector.load %arg4[%c0_5, %c0_6] : memref<1x256xf32, #tpu.memory_space<vmem>>, vector<1x256xf32>
    %7 = vector.broadcast %6 : vector<1x256xf32> to vector<16x256xf32>
    %8 = arith.addf %5, %7 : vector<16x256xf32>
    %cst_7 = arith.constant 0.000000e+00 : f32
    %9 = vector.broadcast %cst_7 : f32 to vector<16x256xf32>
    %10 = arith.maximumf %8, %9 : vector<16x256xf32>
    %11 = arith.truncf %10 : vector<16x256xf32> to vector<16x256xbf16>
    %c0_8 = arith.constant 0 : index
    %c0_9 = arith.constant 0 : index
    %12 = vector.load %arg5[%c0_8, %c0_9] : memref<256x128xbf16, #tpu.memory_space<vmem>>, vector<256x128xbf16>
    %cst_10 = arith.constant dense<0.000000e+00> : vector<16x128xf32>
    %13 = tpu.matmul %11, %12, %cst_10 {dimension_numbers = #tpu.dot_dimension_numbers<[1], [0], [0], [1], [0, 0, 1, 1], [], []>} : vector<16x256xbf16>, vector<256x128xbf16>, vector<16x128xf32> -> vector<16x128xf32>
    %c0_11 = arith.constant 0 : index
    %c0_12 = arith.constant 0 : index
    %14 = vector.load %arg6[%c0_11, %c0_12] : memref<4x128xbf16, #tpu.memory_space<vmem>>, vector<4x128xbf16>
    %cst_13 = arith.constant dense<0.000000e+00> : vector<16x128xf32>
    %15 = tpu.matmul %3, %14, %cst_13 {dimension_numbers = #tpu.dot_dimension_numbers<[1], [0], [0], [1], [0, 0, 1, 1], [], []>} : vector<16x4xbf16>, vector<4x128xbf16>, vector<16x128xf32> -> vector<16x128xf32>
    %16 = arith.addf %13, %15 : vector<16x128xf32>
    %c0_14 = arith.constant 0 : index
    %c0_15 = arith.constant 0 : index
    %17 = vector.load %arg7[%c0_14, %c0_15] : memref<1x128xf32, #tpu.memory_space<vmem>>, vector<1x128xf32>
    %18 = vector.broadcast %17 : vector<1x128xf32> to vector<16x128xf32>
    %19 = arith.addf %16, %18 : vector<16x128xf32>
    %cst_16 = arith.constant 0.000000e+00 : f32
    %20 = vector.broadcast %cst_16 : f32 to vector<16x128xf32>
    %21 = arith.maximumf %19, %20 : vector<16x128xf32>
    %c0_17 = arith.constant 0 : index
    %c0_18 = arith.constant 0 : index
    %22 = vector.load %arg8[%c0_17, %c0_18] : memref<8x128xf32, #tpu.memory_space<vmem>>, vector<8x128xf32>
    %cst_19 = arith.constant dense<0.000000e+00> : vector<8x16xf32>
    %23 = tpu.matmul %22, %21, %cst_19 {dimension_numbers = #tpu.dot_dimension_numbers<[1], [1], [0], [0], [0, 0, 1, 0], [], []>} : vector<8x128xf32>, vector<16x128xf32>, vector<8x16xf32> -> vector<8x16xf32>
    %24 = vector.extract_strided_slice %23 {offsets = [0, 0], sizes = [1, 16], strides = [1, 1]} : vector<8x16xf32> to vector<1x16xf32>
    %c0_20 = arith.constant 0 : index
    %c0_21 = arith.constant 0 : index
    %25 = vector.load %arg9[%c0_20, %c0_21] : memref<1x1xf32, #tpu.memory_space<vmem>>, vector<1x1xf32>
    %26 = vector.broadcast %25 : vector<1x1xf32> to vector<1x16xf32>
    %27 = arith.addf %24, %26 : vector<1x16xf32>
    %c0_22 = arith.constant 0 : index
    %c0_23 = arith.constant 0 : index
    %c0_24 = arith.constant 0 : index
    %28 = vector.load %arg10[%c0_22, %c0_23, %c0_24] : memref<1x1x16xf32, #tpu.memory_space<vmem>>, vector<1x1x16xf32>
    %29 = vector.shape_cast %28 : vector<1x1x16xf32> to vector<1x16xf32>
    %30 = vector.shape_cast %27 : vector<1x16xf32> to vector<1x1x16xf32>
    tpu.vector_store %arg10[%c0_22, %c0_23, %c0_24], %30 {strides = array<i32>} : memref<1x1x16xf32, #tpu.memory_space<vmem>>, vector<1x1x16xf32>,
    return
  }
  func.func @transform_0(%arg0: i32) -> (i32, i32) {
    %c0_i32 = arith.constant 0 : i32
    %c0_i32_0 = arith.constant 0 : i32
    return %arg0, %c0_i32 : i32, i32
  }
  func.func @transform_1(%arg0: i32) -> (i32, i32) {
    %c0_i32 = arith.constant 0 : i32
    %c0_i32_0 = arith.constant 0 : i32
    return %arg0, %c0_i32 : i32, i32
  }
  func.func @transform_2(%arg0: i32) -> (i32, i32) {
    %c0_i32 = arith.constant 0 : i32
    %c0_i32_0 = arith.constant 0 : i32
    %c0_i32_1 = arith.constant 0 : i32
    return %c0_i32, %c0_i32_0 : i32, i32
  }
  func.func @transform_3(%arg0: i32) -> (i32, i32) {
    %c0_i32 = arith.constant 0 : i32
    %c0_i32_0 = arith.constant 0 : i32
    %c0_i32_1 = arith.constant 0 : i32
    return %c0_i32, %c0_i32_0 : i32, i32
  }
  func.func @transform_4(%arg0: i32) -> (i32, i32) {
    %c0_i32 = arith.constant 0 : i32
    %c0_i32_0 = arith.constant 0 : i32
    %c0_i32_1 = arith.constant 0 : i32
    return %c0_i32, %c0_i32_0 : i32, i32
  }
  func.func @transform_5(%arg0: i32) -> (i32, i32) {
    %c0_i32 = arith.constant 0 : i32
    %c0_i32_0 = arith.constant 0 : i32
    %c0_i32_1 = arith.constant 0 : i32
    return %c0_i32, %c0_i32_0 : i32, i32
  }
  func.func @transform_6(%arg0: i32) -> (i32, i32) {
    %c0_i32 = arith.constant 0 : i32
    %c0_i32_0 = arith.constant 0 : i32
    %c0_i32_1 = arith.constant 0 : i32
    return %c0_i32, %c0_i32_0 : i32, i32
  }
  func.func @transform_7(%arg0: i32) -> (i32, i32) {
    %c0_i32 = arith.constant 0 : i32
    %c0_i32_0 = arith.constant 0 : i32
    %c0_i32_1 = arith.constant 0 : i32
    return %c0_i32, %c0_i32_0 : i32, i32
  }
  func.func @transform_8(%arg0: i32) -> (i32, i32) {
    %c0_i32 = arith.constant 0 : i32
    %c0_i32_0 = arith.constant 0 : i32
    %c0_i32_1 = arith.constant 0 : i32
    return %c0_i32, %c0_i32_0 : i32, i32
  }
  func.func @transform_9(%arg0: i32) -> (i32, i32, i32) {
    %c0_i32 = arith.constant 0 : i32
    %c0_i32_0 = arith.constant 0 : i32
    %c0_i32_1 = arith.constant 0 : i32
    return %arg0, %c0_i32, %c0_i32_0 : i32, i32, i32
  }
}

</mosaic_0001>

<bundles_post_ra>
// kernel: tpu_custom_call.1
= control target key start
LH: loop header
LB: loop body
LE: loop exit
PB: predicated region body
PF: predicated region fallthrough
CT: control target
= control target key end

     0   :  { %s715_s0 = inlined_call_operand.vmem [shape: f32[16,8], index: 0, kind: input, shape index: {}]   ;;  %s716_s1 = inlined_call_operand.vmem [shape: f32[16,4], index: 1, kind: input, shape index: {}]   ;;  %s717_s2 = inlined_call_operand.vmem [shape: bf16[8,256], index: 2, kind: input, shape index: {}]   ;;  %s718_s3 = inlined_call_operand.vmem [shape: f32[1,256], index: 3, kind: input, shape index: {}]   ;;  %s719_s4 = inlined_call_operand.hbm [shape: bf16[256,128], index: 4, kind: input, shape index: {}]   ;;  %s720_s5 = inlined_call_operand.vmem [shape: bf16[4,128], index: 5, kind: input, shape index: {}]   ;;  %s721_s6 = inlined_call_operand.vmem [shape: f32[1,128], index: 6, kind: input, shape index: {}]   ;;  %s722_s7 = inlined_call_operand.vmem [shape: f32[8,128], index: 7, kind: input, shape index: {}]   ;;  %s723_s8 = inlined_call_operand.<no memory space> [shape: f32[1,1], index: 8, kind: input, shape index: {}]   ;;  %s724_s9 = inlined_call_operand.hbm [shape: f32[1,1,16], index: 9, kind: output, shape index: {}]  }
   0x1   :  { %v14_v0 = vstv %s723_s8 }
   0x2   :  { %15 = vst [vmem:[#allocation2] sm:$0x1] %v14_v0 }
   0x3   :  { %16 = vsyncpa [#allocation4], 0 }
   0x4   :  { %17 = vsyncpa [#allocation5], 0  ;;  %s603_s11 = smov [#allocation3]   ;;  %s555_s15 = scalar_lea.hbm %s719_s4, 2048 }
   0x5   :  { %s31_s12 = sshll.u32 %s603_s11, 4  ;;  %p556_p0 = scmp.ne.s32.totalorder %s719_s4, %s555_s15  ;;  %s32_s12 = int_to_ptr.vmem [resolvable:$true] %s31_s12 }
   0x6   :  { %p559_p1 = scmp.lt.u32.totalorder %s555_s15, %s719_s4 }
   0x8   :  { %p561_p2 = pnand %p559_p1, %p556_p0 }
   0xa   :  { %564 = shalt.err (!%p561_p2)
}
   0xb   :  { %s565_s8 = scalar_lea.vmem %s32_s12, 2048  ;;  %p570_p4 = scmp.lt.s32.totalorder %s32_s12, %s32_s12 }
   0xc   :  { %p566_p3 = scmp.ne.s32.totalorder %s32_s12, %s565_s8  ;;  %p571_p5 = scmp.lt.s32.totalorder %s565_s8, %s565_s8 }
   0xe   :  { %p572_p6 = por %p571_p5, %p570_p4 }
  0x10   :  { %p573_p7 = pnand %p572_p6, %p566_p3 }
  0x12   :  { %576 = shalt.err (!%p573_p7)
}
  0x13   :  { %s604_s20 = smov 64   ;;  %s605_s21 = smov 4  }
  0x14   :  { %37 = dma.hbm_to_vmem [thread:$0]  %s719_s4, 2048, %s32_s12, [#allocation4], %s604_s20, %s604_s20, %s605_s21  }
  0x15   :  { %599 = dma.done.wait [#allocation4], 2048  }
  0x16   :  { %600 = vsyncadd [#allocation4], 4294965248  ;;  %v606_v1 = vmov 0   ;;  %v56_v2 = vld [vmem:[%s717_s2] sm:$0xff]  ;;  %vm78_vm0 = vcmask 1043456   ;;  %v51_v4 = vld [vmem:[%s715_s0 + $0x8] sm:$0xff]  ;;  %v59_v31 = vlaneseq }
  0x17   :  { %117 = vmatprep.mubr.bf16.mxu1 %v606_v1  ;;  %536 = vset.pattern.permute.xlu0 %v606_v1  ;;  %v50_v3 = vld [vmem:[%s715_s0] sm:$0xff]  ;;  %v464_v5 = vcombine.high %v56_v2, %v56_v2  ;;  %v463_v6 = vcombine.low %v56_v2, %v56_v2  ;;  %v541_v11 = vld [vmem:[#allocation3 + $0x48] sm:$0xff]   ;;  %vm74_vm1 = vcmask 64512   ;;  %v543_v13 = vld [vmem:[#allocation3 + $0x50] sm:$0xff]   ;;  %vm171_vm2 = vcmask 1041408   ;;  %s610_s15 = smov [#allocation6]  }
  0x18   :  { %v539_v7 = vld [vmem:[#allocation3 + $0x40] sm:$0xff]   ;;  %v52_v10 = vpack.c.bf16 %v51_v4, %v50_v3  ;;  %v542_v12 = vld [vmem:[#allocation3 + $0x8] sm:$0xff]   ;;  %v544_v14 = vld [vmem:[#allocation3 + $0x10] sm:$0xff]   ;;  %v607_v26 = vmov 0.0   ;;  %vm608_vm3 = vmmov 0   ;;  %vm167_vm4 = vcmask 31744  }
  0x19   :  { %v540_v8 = vld [vmem:[#allocation3] sm:$0xff]   ;;  %465 = vmatprep.subr.msk.bf16.mxu1 %vm78_vm0, %v464_v5  ;;  %v80_v9 = vsel %vm78_vm0, %v463_v6, 0  ;;  %487 = vmatprep.subr.bf16.mxu0 %v539_v7  ;;  %v545_v15 = vld [vmem:[#allocation3 + $0x58] sm:$0xff]   ;;  %v549_v19 = vld [vmem:[#allocation3 + $0x68] sm:$0xff]   ;;  %v60_v32 = vshrl.u32 %v59_v31, 7  ;;  %v609_v56 = vmov 0.0|0.0  }
  0x1a   :  { %86 = vmatpush1.bf16.msra.mxu1 %v80_v9  ;;  %488 = vmatpush3.bf16.msra.mxu0 %v540_v8  ;;  %v546_v16 = vld [vmem:[#allocation3 + $0x18] sm:$0xff]   ;;  %v547_v17 = vld [vmem:[#allocation3 + $0x60] sm:$0xff]   ;;  %v550_v20 = vld [vmem:[#allocation3 + $0x28] sm:$0xff]   ;;  %s454_s16 = sshll.u32 %s610_s15, 4  ;;  %vm446_vm5 = vcmask 122880   ;;  %s455_s16 = int_to_ptr.vmem [resolvable:$true] %s454_s16 }
  0x1b   :  { %489 = vmatprep.subr.bf16.mxu0 %v541_v11  ;;  %v548_v18 = vld [vmem:[#allocation3 + $0x20] sm:$0xff]   ;;  %v551_v21 = vld [vmem:[#allocation3 + $0x70] sm:$0xff]   ;;  %v553_v23 = vld [vmem:[#allocation3 + $0x78] sm:$0xff]   ;;  %512 = vmatprep.subr.bf16.mxu1 %v607_v26  ;;  %v61_v33 = vsub.s32 0, %v60_v32  ;;  %v65_v35 = vsub.s32 1, %v60_v32  ;;  %s581_s17 = scalar_lea.vmem %s455_s16, 32  ;;  %p582_p9 = scmp.lt.s32.totalorder %s455_s16, %s455_s16 }
  0x1c   :  { %v552_v22 = vld [vmem:[#allocation3 + $0x30] sm:$0xff]   ;;  %v166_v24 = vld [vmem:[%s720_s5] sm:$0x3]  ;;  %v54_v29 = vld [vmem:[%s716_s1 + $0x8] sm:$0xff] }
  0x1d   :  { %466 = vmatmul.mubr.msk.bf16.vlgmr.msra.gmra.mrb[0].mxu1 %vm74_vm1, %v52_v10  ;;  %v554_v25 = vld [vmem:[#allocation3 + $0x38] sm:$0xff]   ;;  %v173_v27 = vsel %vm171_vm2, %v166_v24, 0 }
  0x1e   :  { %490 = vmatpush3.bf16.msra.mxu0 %v542_v12  ;;  %513 = vmatpush3.bf16.msra.mxu1 %v173_v27  ;;  %v53_v28 = vld [vmem:[%s716_s1] sm:$0xff] }
  0x1f   :  { %491 = vmatprep.subr.bf16.mxu0 %v543_v13  ;;  %514 = vmatprep.mubr.msk.bf16.mxu1 %vm608_vm3, %v607_v26  ;;  %v55_v30 = vpack.c.bf16 %v54_v29, %v53_v28  ;;  %v57_v34 = vld [vmem:[%s718_s3] sm:$0x3] }
  0x20   :  { %v62_v36 = vrot.slane %v57_v34, %v61_v33  ;;  %v66_v37 = vrot.slane %v57_v34, %v65_v35  ;;  %525 = vmatprep.subr.bf16.mxu1 %v609_v56  ;;  %v435_v57 = vld [vmem:[#allocation2] sm:$0x1] }
  0x21   :  { %438 = vperm.xlu0 %536, %v435_v57   ;;  %v484_v62 = vld [vmem:[%s721_s6] ss:$0 sm:$0xff]  ;;  %s577_s6 = scalar_lea.vmem %s455_s16, 16 }
  0x22   :  { %492 = vmatpush3.bf16.msra.mxu0 %v544_v14  ;;  %v364_v8 = vld [vmem:[%s722_s7] sm:$0xff]  ;;  %p578_p8 = scmp.ne.s32.totalorder %s455_s16, %s577_s6  ;;  %p583_p10 = scmp.lt.s32.totalorder %s581_s17, %s577_s6 }
  0x23   :  { %493 = vmatprep.subr.bf16.mxu0 %v545_v15 }
  0x24   :  { %p584_p11 = por %p583_p10, %p582_p9 }
  0x25   :  { %515 = vmatmul.mubr.msk.bf16.vlgmr.msra.gmra.mrb[4].mxu1 %vm167_vm4, %v55_v30 }
  0x26   :  { %494 = vmatpush3.bf16.msra.mxu0 %v546_v16  ;;  %522 = vmatprep.mubr.msk.f32.mxu1 %vm608_vm3, %v607_v26  ;;  %p585_p12 = pnand %p584_p11, %p578_p8 }
  0x27   :  { %495 = vmatprep.subr.bf16.mxu0 %v547_v17 }
  0x2a   :  { %496 = vmatpush3.bf16.msra.mxu0 %v548_v18 }
  0x2b   :  { %497 = vmatprep.subr.bf16.mxu0 %v549_v19 }
  0x2e   :  { %498 = vmatpush3.bf16.msra.mxu0 %v550_v20 }
  0x2f   :  { %499 = vmatprep.subr.bf16.mxu0 %v551_v21 }
  0x32   :  { %500 = vmatpush3.bf16.msra.mxu0 %v552_v22 }
  0x33   :  { %501 = vmatprep.subr.bf16.mxu0 %v553_v23 }
  0x36   :  { %502 = vmatpush3.bf16.msra.mxu0 %v554_v25 }
  0xa0   :  { %v439_v9 = vpop.permute.xlu0 %438 }
  0xa1   :  { %v444_v10 = vrot.slane %v439_v9, %v61_v33 }
  0xf0   :  { %v119_v38 = vpop.f32.mrb[0].mxu1 }
  0xf1   :  { %v120_v39 = vadd.f32 %v119_v38, %v62_v36  ;;  %v121_v40 = vpop.f32.mrb[1].mxu1 }
  0xf2   :  { %v122_v41 = vadd.f32 %v121_v40, %v66_v37  ;;  %v123_v42 = vpop.f32.mrb[2].mxu1 }
  0xf3   :  { %v124_v43 = vadd.f32 %v123_v42, %v62_v36  ;;  %v125_v44 = vpop.f32.mrb[3].mxu1  ;;  %v128_v46 = vmax.f32 %v120_v39, 0.0 }
  0xf4   :  { %v126_v45 = vadd.f32 %v125_v44, %v66_v37  ;;  %v129_v48 = vmax.f32 %v122_v41, 0.0 }
  0xf5   :  { %v130_v47 = vmax.f32 %v124_v43, 0.0 }
  0xf6   :  { %v131_v49 = vmax.f32 %v126_v45, 0.0 }
  0xf7   :  { %v132_v50 = vpack.c.bf16 %v130_v47, %v128_v46 }
  0xf8   :  { %v133_v51 = vpack.c.bf16 %v131_v49, %v129_v48  ;;  %v209_v52 = vpop.f32.mrb[4].mxu1 }
  0xf9   :  { %v516_v53 = vpop.f32.mrb[5].mxu1 }
  0xfa   :  { %344 = vmatprep.mubr.bf16.mxu0 %v133_v51  ;;  %v212_v54 = vpop.f32.mrb[6].mxu1 }
  0xfb   :  { %345 = vmatmul.mubr.bf16.vlgmr.msra.gmra.mrb[0].mxu0 %v132_v50  ;;  %v517_v55 = vpop.f32.mrb[7].mxu1 }
 0x1ce   :  { %v503_v58 = vpop.f32.mrb[0].mxu0 }
 0x1cf   :  { %v504_v59 = vpop.f32.mrb[1].mxu0 }
 0x1d0   :  { %v505_v60 = vadd.f32 %v504_v59, %v503_v58  ;;  %v506_v61 = vpop.f32.mrb[2].mxu0 }
 0x1d1   :  { %v507_v63 = vpop.f32.mrb[3].mxu0 }
 0x1d2   :  { %v347_v0 = vadd.f32 %v505_v60, %v209_v52  ;;  %v508_v1 = vadd.f32 %v507_v63, %v506_v61 }
 0x1d4   :  { %v360_v2 = vadd.f32 %v484_v62, %v347_v0  ;;  %v350_v3 = vadd.f32 %v508_v1, %v212_v54 }
 0x1d6   :  { %v361_v4 = vadd.f32 %v484_v62, %v350_v3  ;;  %v362_v5 = vmax.f32 %v360_v2, 0.0 }
 0x1d8   :  { %v363_v6 = vmax.f32 %v361_v4, 0.0 }
 0x1da   :  { %v526_v7 = vpack.c.bf16 %v363_v6, %v362_v5 }
 0x1dc   :  { %527 = vmatpush3.bf16.xpose.msra.mxu1 %v526_v7 }
 0x1e3   :  { %523 = vmatmul.mubr.f32.vlgmr.msra.gmra.mrb[8].mxu1 %v364_v8 }
 0x2b6   :  { %v431_v11 = vpop.f32.mrb[8].mxu1 }
 0x2b7   :  { %v445_v12 = vadd.f32 %v444_v10, %v431_v11  ;;  %v524_v13 = vpop.f32.mrb[9].mxu1 }
 0x2b9   :  { %447 = vst.msk [vmem:[#allocation6] sm:$0x1] %vm446_vm5, %v445_v12 }
 0x2ba   :  { %588 = shalt.err (!%p585_p12)
}
 0x2bb   :  { %s589_s19 = scalar_lea.hbm %s724_s9, 16 }
 0x2bc   :  { %p590_p13 = scmp.ne.s32.totalorder %s724_s9, %s589_s19  ;;  %p593_p0 = scmp.lt.u32.totalorder %s589_s19, %s724_s9 }
 0x2be   :  { %p595_p1 = pnand %p593_p0, %p590_p13 }
 0x2c0   :  { %598 = shalt.err (!%p595_p1)
}
 0x2c1   :  { %457 = dma.vmem_to_hbm [thread:$0]  %s455_s16, 16, %s724_s9, [#allocation5]  }
 0x2c2   :  { %601 = dma.done.wait [#allocation5], 16  }
 0x2c3   :  { %602 = vsyncadd [#allocation5], 4294967280 }
 0x2c4   :  { %461 = vsyncpa [#allocation4], 1 }
 0x2c5   :  { %462 = vsyncpa [#allocation5], 1 }

</bundles_post_ra>
